<compile_context>
chip_gen: v7x
topology: tpu7x:2x2x1
jax: 0.10.0
libtpu: 0.0.40
codegen_flags: <defaults>
</compile_context>

<pallas_src>
import math

import jax
import jax.numpy as jnp
from jax.experimental import pallas as pl
from jax.experimental.pallas import tpu as pltpu


def _round_up(x, m):
    return ((x + m - 1) // m) * m


def _cdiv(a, b):
    return (a + b - 1) // b


_VMEM_BUDGET = 40 * 1024 * 1024       # double-buffered working-set budget (fits v7x)
_VMEM_LIMIT = 48 * 1024 * 1024        # explicit scoped-VMEM limit (covers v5e default=16MiB)


# ---------------------------------------------------------------------------
# Kernels
# ---------------------------------------------------------------------------
def _sage_kernel(self_ref, agg_ref, w_self_ref, w_agg_ref, out_ref):
    # out = relu(self @ W_self + agg @ W_agg); f32 MXU accumulation, fused ReLU,
    # lane-dense (multiple-of-128) store.
    acc = jnp.dot(self_ref[...], w_self_ref[...], preferred_element_type=jnp.float32)
    acc = acc + jnp.dot(agg_ref[...], w_agg_ref[...], preferred_element_type=jnp.float32)
    out_ref[...] = jnp.maximum(acc, 0.0).astype(out_ref.dtype)


def _sage_kernel_gcn(agg_ref, w_ref, out_ref):
    acc = jnp.dot(agg_ref[...], w_ref[...], preferred_element_type=jnp.float32)
    out_ref[...] = jnp.maximum(acc, 0.0).astype(out_ref.dtype)


# ---------------------------------------------------------------------------
# One-time per-layer weight preparation (hoisted out of the hot path)
# ---------------------------------------------------------------------------
def prepare_sage_weight(weight, *, gcn=False, weight_dtype=None):
    """Transpose / lane-pad / split / (optionally cast) the PyTorch weight once.

    weight: (out_size, D) if gcn else (out_size, 2*D)   -- PyTorch layout.
    Returns (weights_tuple, out_size) where each weight block is (D, out_p)
    with out_p a multiple of 128 (zero column padding).
    """
    out_size = weight.shape[0]
    out_p = _round_up(out_size, 128)
    w = weight.T                                           # (K, out_size)
    if out_p != out_size:
        w = jnp.pad(w, ((0, 0), (0, out_p - out_size)))
    if weight_dtype is not None:
        w = w.astype(weight_dtype)
    if gcn:
        return (w,), out_size
    d = w.shape[0] // 2
    return (w[:d], w[d:]), out_size


# ---------------------------------------------------------------------------
# Forward
# ---------------------------------------------------------------------------
def sage_layer_forward(self_feats, aggregate_feats, prepped, *, gcn=False, tm=256):
    """Pallas implementation of SageLayer.forward.

    self_feats:       (N, D)
    aggregate_feats:  (N, D)
    prepped:          output of prepare_sage_weight(weight, gcn=...)
    returns:          (N, out_size) float32
    """
    weights, out_size = prepped
    n, d = aggregate_feats.shape
    out_p = weights[0].shape[1]
    n_inputs = 1 if gcn else 2

    acts = (aggregate_feats,) if gcn else (self_feats, aggregate_feats)
    act_itemsize = jnp.dtype(acts[0].dtype).itemsize
    w_itemsize = jnp.dtype(weights[0].dtype).itemsize

    # --- row tile: multiple of 8 (16 for packed bf16 activations) -----------
    mult = 16 if act_itemsize < 4 else 8
    if n <= mult:
        tm = n                                  # full-extent block, no ragged tile
    else:
        tm = max(mult, (min(tm, _round_up(n, mult)) // mult) * mult)

    # --- VMEM working-set model (double-buffered tiles) ----------------------
    def working_set(tm_, tn_):
        a = n_inputs * 2 * tm_ * d * act_itemsize
        w = n_inputs * 2 * d * tn_ * w_itemsize
        o = 2 * tm_ * tn_ * 4
        return a + w + o

    # --- column tile: resident weight (tn = out_p) when it fits -------------
    q_total = out_p // 128
    tn_candidates = sorted({128 * q for q in range(1, q_total + 1) if q_total % q == 0},
                           reverse=True)
    tn = tn_candidates[-1]
    for cand in tn_candidates:
        if working_set(tm, cand) <= _VMEM_BUDGET:
            tn = cand
            break
    while working_set(tm, tn) > _VMEM_BUDGET and tm > mult:
        tm = max(mult, (tm // 2 // mult) * mult)

    # --- ensure >= 2 parallel grid steps so both v7x TensorCores get work ---
    if n > mult and _cdiv(n, tm) < 2 and (out_p // tn) < 2:
        tm = _round_up(_cdiv(n, 2), mult)

    grid = (_cdiv(n, tm), out_p // tn)

    act_spec = pl.BlockSpec((tm, d), lambda i, j: (i, 0))
    w_spec = pl.BlockSpec((d, tn), lambda i, j: (0, j))
    out_spec = pl.BlockSpec((tm, tn), lambda i, j: (i, j))

    if gcn:
        kernel = _sage_kernel_gcn
        in_specs = [act_spec, w_spec]
        operands = (aggregate_feats, weights[0])
    else:
        kernel = _sage_kernel
        in_specs = [act_spec, act_spec, w_spec, w_spec]
        operands = (self_feats, aggregate_feats, weights[0], weights[1])

    k_total = n_inputs * d
    cost = pl.CostEstimate(
        flops=2 * n * k_total * out_p,
        transcendentals=0,
        bytes_accessed=(n_inputs * n * d * act_itemsize
                        + k_total * out_p * w_itemsize
                        + n * out_p * 4),
    )

    out = pl.pallas_call(
        kernel,
        out_shape=jax.ShapeDtypeStruct((n, out_p), jnp.float32),
        grid_spec=pltpu.PrefetchScalarGridSpec(
            num_scalar_prefetch=0,
            grid=grid,
            in_specs=in_specs,
            out_specs=out_spec,
        ),
        compiler_params=pltpu.CompilerParams(
            dimension_semantics=("parallel", "parallel"),
            vmem_limit_bytes=_VMEM_LIMIT,
        ),
        cost_estimate=cost,
    )(*operands)

    return out[:, :out_size] if out_p != out_size else out


def _xavier_uniform(key, shape):
    # matches nn.init.xavier_uniform_ for a 2-D weight (fan_out, fan_in)
    fan_out, fan_in = shape
    bound = math.sqrt(6.0 / (fan_in + fan_out))
    return jax.random.uniform(key, shape, jnp.float32, -bound, bound)


if __name__ == "__main__":
    key = jax.random.PRNGKey(0)
    k_self, k_agg, k_w, k_wg = jax.random.split(key, 4)

    N = 16            # batch of nodes
    input_size = 32   # feature dim D
    out_size = 64

    self_feats = jax.random.normal(k_self, (N, input_size), jnp.float32)
    aggregate_feats = jax.random.normal(k_agg, (N, input_size), jnp.float32)

    # --- gcn=False path ------------------------------------------------------
    # PyTorch param shape: (out_size, 2*input_size)
    weight = _xavier_uniform(k_w, (out_size, 2 * input_size))
    prepped = prepare_sage_weight(weight, gcn=False)          # one-time layer setup
    out = sage_layer_forward(self_feats, aggregate_feats, prepped, gcn=False)
    out = jax.block_until_ready(out)

    combined = jnp.concatenate([self_feats, aggregate_feats], axis=1)
    ref = jnp.maximum(weight @ combined.T, 0.0).T
    assert out.shape == (N, out_size)
    assert jnp.allclose(out, ref, atol=1e-5, rtol=1e-5)

    # --- gcn=True path (single (out_size, D) weight, aggregate feats only) ---
    weight_gcn = _xavier_uniform(k_wg, (out_size, input_size))
    prepped_g = prepare_sage_weight(weight_gcn, gcn=True)
    out_g = sage_layer_forward(self_feats, aggregate_feats, prepped_g, gcn=True)
    out_g = jax.block_until_ready(out_g)
    ref_g = jnp.maximum(weight_gcn @ aggregate_feats.T, 0.0).T
    assert out_g.shape == (N, out_size)
    assert jnp.allclose(out_g, ref_g, atol=1e-5, rtol=1e-5)

    print("KERNEL_OK")
</pallas_src>

<mosaic_0001>
module attributes {stable_mosaic.version = 11 : i64} {
  func.func @_sage_kernel(%arg0: i32, %arg1: i32, %arg2: memref<8x32xf32, #tpu.memory_space<vmem>>, %arg3: memref<8x32xf32, #tpu.memory_space<vmem>>, %arg4: memref<32x128xf32, #tpu.memory_space<vmem>>, %arg5: memref<32x128xf32, #tpu.memory_space<vmem>>, %arg6: memref<8x128xf32, #tpu.memory_space<vmem>>) attributes {dimension_semantics = [#tpu.dimension_semantics<parallel>, #tpu.dimension_semantics<parallel>], iteration_bounds = array<i64: 2, 1>, scalar_prefetch = 0 : i64, scratch_operands = 0 : i64, tpu.core_type = #tpu.core_type<tc>, window_params = [{transform_indices = @transform_0, window_bounds = array<i64: 8, 32>}, {transform_indices = @transform_1, window_bounds = array<i64: 8, 32>}, {transform_indices = @transform_2, window_bounds = array<i64: 32, 128>}, {transform_indices = @transform_3, window_bounds = array<i64: 32, 128>}, {transform_indices = @transform_4, window_bounds = array<i64: 8, 128>}]} {
    %c0 = arith.constant 0 : index
    %c0_0 = arith.constant 0 : index
    %0 = vector.load %arg2[%c0, %c0_0] : memref<8x32xf32, #tpu.memory_space<vmem>>, vector<8x32xf32>
    %c0_1 = arith.constant 0 : index
    %c0_2 = arith.constant 0 : index
    %1 = vector.load %arg4[%c0_1, %c0_2] : memref<32x128xf32, #tpu.memory_space<vmem>>, vector<32x128xf32>
    %cst = arith.constant dense<0.000000e+00> : vector<8x128xf32>
    %2 = tpu.matmul %0, %1, %cst {dimension_numbers = #tpu.dot_dimension_numbers<[1], [0], [0], [1], [0, 0, 1, 1], [], []>} : vector<8x32xf32>, vector<32x128xf32>, vector<8x128xf32> -> vector<8x128xf32>
    %c0_3 = arith.constant 0 : index
    %c0_4 = arith.constant 0 : index
    %3 = vector.load %arg3[%c0_3, %c0_4] : memref<8x32xf32, #tpu.memory_space<vmem>>, vector<8x32xf32>
    %c0_5 = arith.constant 0 : index
    %c0_6 = arith.constant 0 : index
    %4 = vector.load %arg5[%c0_5, %c0_6] : memref<32x128xf32, #tpu.memory_space<vmem>>, vector<32x128xf32>
    %cst_7 = arith.constant dense<0.000000e+00> : vector<8x128xf32>
    %5 = tpu.matmul %3, %4, %cst_7 {dimension_numbers = #tpu.dot_dimension_numbers<[1], [0], [0], [1], [0, 0, 1, 1], [], []>} : vector<8x32xf32>, vector<32x128xf32>, vector<8x128xf32> -> vector<8x128xf32>
    %6 = arith.addf %2, %5 : vector<8x128xf32>
    %cst_8 = arith.constant 0.000000e+00 : f32
    %7 = vector.broadcast %cst_8 : f32 to vector<8x128xf32>
    %8 = arith.maximumf %6, %7 : vector<8x128xf32>
    %c0_9 = arith.constant 0 : index
    %c0_10 = arith.constant 0 : index
    %9 = vector.load %arg6[%c0_9, %c0_10] : memref<8x128xf32, #tpu.memory_space<vmem>>, vector<8x128xf32>
    tpu.vector_store %arg6[%c0_9, %c0_10], %8 {strides = array<i32>} : memref<8x128xf32, #tpu.memory_space<vmem>>, vector<8x128xf32>,
    return
  }
  func.func @transform_0(%arg0: i32, %arg1: i32) -> (i32, i32) {
    %c0_i32 = arith.constant 0 : i32
    %c0_i32_0 = arith.constant 0 : i32
    return %arg0, %c0_i32 : i32, i32
  }
  func.func @transform_1(%arg0: i32, %arg1: i32) -> (i32, i32) {
    %c0_i32 = arith.constant 0 : i32
    %c0_i32_0 = arith.constant 0 : i32
    return %arg0, %c0_i32 : i32, i32
  }
  func.func @transform_2(%arg0: i32, %arg1: i32) -> (i32, i32) {
    %c0_i32 = arith.constant 0 : i32
    %c0_i32_0 = arith.constant 0 : i32
    return %c0_i32, %arg1 : i32, i32
  }
  func.func @transform_3(%arg0: i32, %arg1: i32) -> (i32, i32) {
    %c0_i32 = arith.constant 0 : i32
    %c0_i32_0 = arith.constant 0 : i32
    return %c0_i32, %arg1 : i32, i32
  }
  func.func @transform_4(%arg0: i32, %arg1: i32) -> (i32, i32) {
    %c0_i32 = arith.constant 0 : i32
    return %arg0, %arg1 : i32, i32
  }
}

</mosaic_0001>

<bundles_post_ra>
// kernel: tpu_custom_call.1
= control target key start
LH: loop header
LB: loop body
LE: loop exit
PB: predicated region body
PF: predicated region fallthrough
CT: control target
= control target key end

     0   :  { %s1306_s0 = inlined_call_operand.hbm [shape: f32[16,32], index: 0, kind: input, shape index: {}]   ;;  %s1307_s1 = inlined_call_operand.hbm [shape: f32[16,32], index: 1, kind: input, shape index: {}]   ;;  %s1308_s2 = inlined_call_operand.hbm [shape: f32[32,128], index: 2, kind: input, shape index: {}]   ;;  %s1309_s3 = inlined_call_operand.hbm [shape: f32[32,128], index: 3, kind: input, shape index: {}]   ;;  %s1310_s4 = inlined_call_operand.hbm [shape: f32[16,128], index: 4, kind: output, shape index: {}]  }
   0x1   :  { %1316 = sst [smem:[#allocation17_spill]] %s1308_s2 }
   0x2   :  { %1317 = sst [smem:[#allocation18_spill]] %s1309_s3 }
   0x3   :  { %9 = vsyncpa [#allocation3], 0 }
   0x4   :  { %11 = vsyncpa [#allocation3 + $0x1], 0 }
   0x5   :  { %12 = vsyncpa [#allocation6], 0 }
   0x6   :  { %14 = vsyncpa [#allocation6 + $0x1], 0 }
   0x7   :  { %15 = vsyncpa [#allocation9], 0 }
   0x8   :  { %16 = vsyncpa [#allocation4], 0 }
   0x9   :  { %18 = vsyncpa [#allocation4 + $0x1], 0  ;;  %s1013_s15 = smov 0   ;;  %s1015_s16 = smov 0  }
   0xa   :  { %s1017_s17 = smov 0   ;;  %s1019_s18 = smov 0  }
   0xb   :  { %s1021_s19 = smov 0   ;;  %s1023_s20 = smov 0  }
   0xc LB: > { %s1044_s21 = sadd.s32 4294967295, %s976_s20   ;;  %s607_s22 = sadd.s32 4294967294, %s976_s20   ;;  %s976_s20 = sphi %s1023_s20, %s24_s20   ;;  %s972_s19 = sphi %s1021_s19, %s1342_s19   ;;  %s968_s18 = sphi %s1019_s18, %s1341_s18   ;;  %s964_s17 = sphi %s1017_s17, %s1340_s17   ;;  %s960_s16 = sphi %s1015_s16, %s1339_s16   ;;  %s956_s15 = sphi %s1013_s15, %s1338_s15  }
   0xd   : > { %p56_p0 = scmp.ne.s32.totalorder %s960_s16, %s956_s15  ;;  %p1311_p1 = scmp.eq.s32.totalorder %s1044_s21, 0 }
   0xe   : > { %p166_p3 = scmp.eq.s32.totalorder %s607_s22, 1  ;;  %p608_p5 = scmp.ge.s32.totalorder %s976_s20, 1 }
   0xf   : > { %p1053_p4 = por %p1311_p1, %p56_p0  ;;  %p173_p7 = scmp.lt.s32.totalorder %s976_s20, 3 }
  0x10   : > { %p1058_p6 = por %p166_p3, %p56_p0  ;;  %s978_s26 = smov [#allocation7]  }
  0x11   : > { %s1318_s23 = scalar_select %p1053_p4, 1, 0 }
  0x12   : > { %s1319_s24 = scalar_select %p1058_p6, 1, 0 }
  0x13   : > { %p1063_p8 = pnand %p608_p5, %p173_p7  ;;  %s187_s27 = sshll.u32 %s978_s26, 4  ;;  %s1067_s27 = int_to_ptr.vmem [resolvable:$true] %s187_s27 }
  0x14   : > { %s979_s29 = smov [#allocation8]   ;;  %s1322_s2 = sld [smem:[#allocation17_spill]] }
  0x15   : > { %s1320_s25 = scalar_select %p1063_p8, 1, 0 }
  0x16   : > { %p687_p9 = pneg %p1063_p8  ;;  %s202_s30 = sshll.u32 %s979_s29, 4  ;;  %s1078_s30 = int_to_ptr.vmem [resolvable:$true] %s202_s30 }
  0x18   : > { %p1074_p11 = pnand %p687_p9, %p1311_p1 }
  0x1a   : > { %s766_s7 = scalar_lea.hbm %s1322_s2, 512  ;;  %p768_p13 = pneg %p1074_p11 }
  0x1b   : > { %p767_p12 = scmp.ne.s32.totalorder %s1322_s2, %s766_s7  ;;  %p773_p5 = scmp.lt.u32.totalorder %s766_s7, %s1322_s2 }
  0x1d   : > { %p769_p0 = pnand %p768_p13, %p767_p12 }
  0x1f   : > { %p770_p3 = pneg %p769_p0 }
  0x21   : > { %p775_p7 = pnand %p773_p5, %p770_p3 }
  0x23   : > { %778 = shalt.err (!%p775_p7)
}
  0x24   : > { %s779_s12 = scalar_lea.vmem %s1067_s27, 512  ;;  %p787_p2 = scmp.lt.s32.totalorder %s1067_s27, %s1067_s27 }
  0x25   : > { %p780_p9 = scmp.ne.s32.totalorder %s1067_s27, %s779_s12  ;;  %p788_p12 = scmp.lt.s32.totalorder %s779_s12, %s779_s12 }
  0x27   : > { %p782_p10 = pnand %p780_p9, %p768_p13  ;;  %p789_p0 = por %p788_p12, %p787_p2 }
  0x29   : > { %p783_p1 = pneg %p782_p10 }
  0x2b   : > { %p790_p6 = pnand %p789_p0, %p783_p1 }
  0x2d   : > { %793 = shalt.err (!%p790_p6)
}
  0x2e   : > { %s980_s13 = smov 128   ;;  %s981_s14 = smov 8  }
  0x2f   : > { %690 = dma.hbm_to_vmem [thread:$0]  (!%p1074_p11), %s1322_s2, 512, %s1067_s27, [#allocation6], %s980_s13, %s980_s13, %s981_s14  }
  0x30   : > { %s1323_s3 = sld [smem:[#allocation18_spill]] }
  0x36   : > { %s794_s6 = scalar_lea.hbm %s1323_s3, 512 }
  0x37   : > { %p795_p2 = scmp.ne.s32.totalorder %s1323_s3, %s794_s6  ;;  %p801_p10 = scmp.lt.u32.totalorder %s794_s6, %s1323_s3 }
  0x39   : > { %p797_p1 = pnand %p795_p2, %p768_p13 }
  0x3b   : > { %p798_p6 = pneg %p797_p1 }
  0x3d   : > { %p803_p3 = pnand %p801_p10, %p798_p6 }
  0x3f   : > { %806 = shalt.err (!%p803_p3)
}
  0x40   : > { %s807_s27 = scalar_lea.vmem %s1078_s30, 512  ;;  %p815_p12 = scmp.lt.s32.totalorder %s1078_s30, %s1078_s30 }
  0x41   : > { %p808_p5 = scmp.ne.s32.totalorder %s1078_s30, %s807_s27  ;;  %p816_p0 = scmp.lt.s32.totalorder %s807_s27, %s807_s27 }
  0x43   : > { %p810_p7 = pnand %p808_p5, %p768_p13  ;;  %p817_p2 = por %p816_p0, %p815_p12 }
  0x45   : > { %p811_p9 = pneg %p810_p7 }
  0x47   : > { %p818_p1 = pnand %p817_p2, %p811_p9 }
  0x49   : > { %821 = shalt.err (!%p818_p1)
}
  0x4a   : > { %693 = dma.hbm_to_vmem [thread:$0]  (!%p1074_p11), %s1323_s3, 512, %s1078_s30, [#allocation9], %s980_s13, %s980_s13, %s981_s14  }
  0x4b   : > { %s36_s22 = sadd.s32 1, %s972_s19  ;;  %s43_s26 = sadd.s32 1, %s964_s17 }
  0x4c   : > { %p38_p13 = scmp.ge.s32.totalorder %s36_s22, 2  ;;  %p50_p6 = scmp.ne.s32.totalorder %s964_s17, %s960_s16 }
  0x4d   : > { %p51_p10 = scmp.eq.s32.totalorder %s976_s20, 0  ;;  %p707_p3 = scmp.lt.s32.totalorder %s976_s20, 2 }
  0x4e   : > { %s1344_s22 = smov (%p38_p13, %s36_s22), 0  ;;  %p1325_p7 = scmp.eq.s32.totalorder %s1044_s21, 1 }
  0x4f   : > { %1324 = sst [smem:[#allocation16_spill]] %s1344_s22  ;;  %p52_p5 = por %p51_p10, %p50_p6 }
  0x50   : > { %p1142_p9 = por %p1325_p7, %p50_p6  ;;  %s40_s29 = ssub.s32 %s972_s19, %s1344_s22 }
  0x51   : > { %s216_s5 = sand.u32 1, %s964_s17   ;;  %p41_p12 = scmp.eq.s32.totalorder %s40_s29, 0 }
  0x52   : > { %s1326_s28 = scalar_select %p1142_p9, 1, 0 }
  0x53   : > { %s1149_s30 = sshll.u32 %s216_s5, 3  ;;  %s613_s13 = sshll.u32 %s972_s19, 7 }
  0x54   : > { %s1153_s14 = scalar_select %p41_p12, %s964_s17, %s43_s26  }
  0x55   : > { %s1158_s8 = scalar_lea.hbm %s1306_s0, %s613_s13  ;;  %s220_s9 = scalar_lea.vmem [#allocation2], %s1149_s30 }
  0x56   : > { %s227_s10 = sshll.u32 %s220_s9, 4  ;;  %p1163_p11 = pnand %p707_p3, %p52_p5  ;;  %s1167_s10 = int_to_ptr.vmem [resolvable:$true] %s227_s10 }
  0x57   : > { %s1172_s26 = scalar_lea.hbm %s1307_s1, %s613_s13  ;;  %s217_s29 = scalar_lea.sflag [#allocation3], %s216_s5 }
  0x58   : > { %s822_s6 = scalar_lea.hbm %s1158_s8, 128  ;;  %p824_p2 = pneg %p1163_p11 }
  0x59   : > { %p823_p0 = scmp.ne.s32.totalorder %s1158_s8, %s822_s6  ;;  %s827_s2 = scalar_lea.hbm %s1306_s0, 256 }
  0x5a   : > { %p828_p6 = scmp.lt.u32.totalorder %s1158_s8, %s1306_s0  ;;  %p829_p10 = scmp.lt.u32.totalorder %s827_s2, %s822_s6 }
  0x5b   : > { %p825_p1 = pnand %p824_p2, %p823_p0  ;;  %p831_p5 = scmp.lt.u32.totalorder %s822_s6, %s1158_s8 }
  0x5c   : > { %p830_p3 = por %p829_p10, %p828_p6 }
  0x5d   : > { %p826_p13 = pneg %p825_p1 }
  0x5e   : > { %p832_p7 = por %p831_p5, %p830_p3 }
  0x60   : > { %p833_p12 = pnand %p832_p7, %p826_p13 }
  0x62   : > { %836 = shalt.err (!%p833_p12)
}
  0x63   : > { %s837_s5 = scalar_lea.vmem %s1167_s10, 128  ;;  %s982_s13 = smov [#allocation2]  }
  0x64   : > { %p838_p0 = scmp.ne.s32.totalorder %s1167_s10, %s837_s5  ;;  %s842_s11 = sshll.u32 %s982_s13, 4  ;;  %s843_s11 = int_to_ptr.vmem [resolvable:$false] %s842_s11 }
  0x65   : > { %s844_s3 = scalar_lea.vmem %s843_s11, 256  ;;  %p845_p4 = scmp.lt.s32.totalorder %s1167_s10, %s843_s11 }
  0x66   : > { %p840_p1 = pnand %p838_p0, %p824_p2  ;;  %p846_p6 = scmp.lt.s32.totalorder %s844_s3, %s837_s5 }
  0x68   : > { %p841_p9 = pneg %p840_p1  ;;  %p847_p10 = por %p846_p6, %p845_p4 }
  0x6a   : > { %p848_p3 = pnand %p847_p10, %p841_p9 }
  0x6c   : > { %851 = shalt.err (!%p848_p3)
}
  0x6d   : > { %697 = dma.hbm_to_vmem [thread:$0]  (!%p1163_p11), %s1158_s8, 128, %s1167_s10, %s217_s29  }
  0x6e   : > { %s234_s2 = sand.u32 1, %s976_s20   ;;  %s238_s22 = scalar_lea.vmem [#allocation5], %s1149_s30 }
  0x6f   : > { %s245_s12 = sshll.u32 %s238_s22, 4  ;;  %s235_s6 = scalar_lea.sflag [#allocation6], %s234_s2  ;;  %s246_s12 = int_to_ptr.vmem [resolvable:$true] %s245_s12 }
  0x70   : > { %s852_s7 = scalar_lea.hbm %s1172_s26, 128  ;;  %s857_s13 = scalar_lea.hbm %s1307_s1, 256 }
  0x71   : > { %p853_p4 = scmp.ne.s32.totalorder %s1172_s26, %s852_s7  ;;  %p858_p5 = scmp.lt.u32.totalorder %s1172_s26, %s1307_s1 }
  0x72   : > { %p859_p7 = scmp.lt.u32.totalorder %s857_s13, %s852_s7  ;;  %p861_p0 = scmp.lt.u32.totalorder %s852_s7, %s1172_s26 }
  0x73   : > { %p855_p9 = pnand %p853_p4, %p824_p2 }
  0x74   : > { %p860_p12 = por %p859_p7, %p858_p5 }
  0x75   : > { %p856_p13 = pneg %p855_p9 }
  0x76   : > { %p862_p1 = por %p861_p0, %p860_p12 }
  0x78   : > { %p863_p6 = pnand %p862_p1, %p856_p13 }
  0x7a   : > { %866 = shalt.err (!%p863_p6)
}
  0x7b   : > { %s867_s30 = scalar_lea.vmem %s246_s12, 128  ;;  %s983_s8 = smov [#allocation5]  }
  0x7c   : > { %p868_p10 = scmp.ne.s32.totalorder %s246_s12, %s867_s30  ;;  %s872_s10 = sshll.u32 %s983_s8, 4  ;;  %s873_s10 = int_to_ptr.vmem [resolvable:$false] %s872_s10 }
  0x7d   : > { %s874_s29 = scalar_lea.vmem %s873_s10, 256  ;;  %p875_p9 = scmp.lt.s32.totalorder %s246_s12, %s873_s10 }
  0x7e   : > { %p870_p3 = pnand %p868_p10, %p824_p2  ;;  %p876_p8 = scmp.lt.s32.totalorder %s874_s29, %s867_s30 }
  0x80   : > { %p871_p4 = pneg %p870_p3  ;;  %p877_p5 = por %p876_p8, %p875_p9 }
  0x82   : > { %p878_p7 = pnand %p877_p5, %p871_p4 }
  0x84   : > { %881 = shalt.err (!%p878_p7)
}
  0x85   : > { %700 = dma.hbm_to_vmem [thread:$0]  (!%p1163_p11), %s1172_s26, 128, %s246_s12, %s235_s6  }
  0x86   : > { %p1328_p13 = scmp.ne.s32.totalorder %s1320_s25, 0 }
  0x87   : > { %s1223_s2 = sand.u32 (!%p1328_p13), 1, %s960_s16   ;;  %p1329_p8 = scmp.ne.s32.totalorder (!%p1328_p13), %s1318_s23, 0 }
  0x88   : > { %254 = sbr.rel (%p1328_p13) target bundleno = 396 (0x18c), region = 36  ;;  %s1226_s22 = sshll.u32 (!%p1328_p13), %s1223_s2, 3 }
  0x89   : > { %s257_s7 = scalar_lea.sflag (!%p1328_p13), [#allocation3], %s1223_s2  ;;  %s260_s9 = scalar_lea.vmem (!%p1328_p13), [#allocation2], %s1226_s22 }
  0x8f   : > { %935 = dma.done.wait (%p1329_p8), %s257_s7, 128  }
  0x90   : > { %937 = vsyncadd (%p1329_p8), %s257_s7, 4294967168  ;;  %s265_s25 = sand.u32 1, %s1044_s21   ;;  %s269_s26 = scalar_lea.vmem [#allocation5], %s1226_s22 }
  0x91   : > { %s266_s27 = scalar_lea.sflag [#allocation6], %s265_s25 }
  0x92   : > { %939 = dma.done.wait (%p1329_p8), %s266_s27, 128  }
  0x93   : > { %941 = vsyncadd (%p1329_p8), %s266_s27, 4294967168  ;;  %p1330_p11 = scmp.eq.s32.totalorder %s1044_s21, 0 }
  0x95   : > { %943 = dma.done.wait (%p1330_p11), [#allocation6], 512   ;;  %p1331_p2 = pmov %p1330_p11 }
  0x97   : > { %945 = vsyncadd (%p1331_p2), [#allocation6], 4294966784  ;;  %p1332_p12 = pmov %p1331_p2 }
  0x98   : > { %p1333_p0 = pmov %p1331_p2 }
  0x99   : > { %947 = dma.done.wait (%p1332_p12), [#allocation9], 512  }
  0x9a   : > { %949 = vsyncadd (%p1333_p0), [#allocation9], 4294966784  ;;  %v984_v0 = vmov 0.0|0.0   ;;  %vm985_vm0 = vmmov 0   ;;  %v986_v1 = vmov 0.0   ;;  %v313_v2 = vld [vmem:[#allocation8] sm:$0xff] }
  0x9b   : > { %660 = vmatprep.subr.bf16.mxu1 %v984_v0  ;;  %666 = vmatprep.subr.bf16.mxu0 %v984_v0  ;;  %v314_v3 = vld [vmem:[#allocation8 + $0x8] sm:$0xff]  ;;  %v308_v4 = vld [vmem:[#allocation7] sm:$0xff]  ;;  %v315_v7 = vld [vmem:[#allocation8 + $0x10] sm:$0xff]  ;;  %vm317_vm1 = vcmask 261120   ;;  %s625_s21 = sshll.u32 %s968_s18, 7  ;;  %s306_s23 = scalar_lea.vmem [#allocation10], %s1226_s22 }
  0x9c   : > { %646 = vmatprep.mubr.msk.f32.mxu1 %vm985_vm0, %v986_v1  ;;  %657 = vmatprep.mubr.msk.f32.mxu0 %vm985_vm0, %v986_v1  ;;  %v661_v5 = vpack.c.bf16 %v314_v3, %v313_v2  ;;  %v309_v6 = vld [vmem:[#allocation7 + $0x8] sm:$0xff]  ;;  %v316_v8 = vld [vmem:[#allocation8 + $0x18] sm:$0xff]  ;;  %v310_v10 = vld [vmem:[#allocation7 + $0x10] sm:$0xff]  ;;  %s481_s12 = sshll.u32 %s306_s23, 4  ;;  %s1257_s13 = scalar_lea.hbm %s1310_s4, %s625_s21  ;;  %s1259_s12 = int_to_ptr.vmem [resolvable:$true] %s481_s12 }
  0x9d   : > { %v667_v9 = vpack.c.bf16 %v309_v6, %v308_v4  ;;  %v311_v11 = vld [vmem:[#allocation7 + $0x18] sm:$0xff]  ;;  %v664_v12 = vpack.c.bf16 %v316_v8, %v315_v7  ;;  %v307_v15 = vld [vmem:[%s260_s9] sm:$0xff]  ;;  %s467_s11 = scalar_lea.sflag [#allocation4], %s1223_s2  ;;  %s882_s3 = scalar_lea.vmem %s1259_s12, 128 }
  0x9e   : > { %662 = vmatpush3.bf16.msra.mxu1 %v661_v5  ;;  %v670_v13 = vpack.c.bf16 %v311_v11, %v310_v10  ;;  %v312_v14 = vld [vmem:[%s269_s26] sm:$0xff]  ;;  %p883_p1 = scmp.ne.s32.totalorder %s1259_s12, %s882_s3  ;;  %p1334_p6 = scmp.ne.s32.totalorder %s1326_s28, 0 }
  0x9f   : > { %668 = vmatpush3.bf16.msra.mxu0 %v667_v9  ;;  %663 = vmatprep.subr.bf16.mxu1 %v984_v0  ;;  %s987_s18 = smov [#allocation10]  }
  0xa0   : > { %669 = vmatprep.subr.bf16.mxu0 %v984_v0  ;;  %p884_p10 = pnand %p883_p1, %p1334_p6  ;;  %s886_s30 = sshll.u32 %s987_s18, 4  ;;  %s887_s30 = int_to_ptr.vmem [resolvable:$false] %s886_s30 }
  0xa1   : > { %s888_s8 = scalar_lea.vmem %s887_s30, 256  ;;  %p889_p4 = scmp.lt.s32.totalorder %s1259_s12, %s887_s30 }
  0xa2   : > { %665 = vmatpush3.bf16.msra.mxu1 %v664_v12  ;;  %p885_p3 = pneg %p884_p10  ;;  %p890_p9 = scmp.lt.s32.totalorder %s888_s8, %s882_s3 }
  0xa3   : > { %671 = vmatpush3.bf16.msra.mxu0 %v670_v13 }
  0xa4   : > { %p891_p5 = por %p890_p9, %p889_p4 }
  0xa5   : > { %647 = vmatmul.mubr.msk.f32.vlgmr.msra.gmra.mrb[0].mxu1 %vm317_vm1, %v312_v14 }
  0xa6   : > { %658 = vmatmul.mubr.msk.f32.vlgmr.msra.gmra.mrb[0].mxu0 %vm317_vm1, %v307_v15  ;;  %p892_p7 = pnand %p891_p5, %p885_p3 }
 0x178   : > { %v387_v16 = vpop.f32.mrb[0].mxu1 }
 0x179   : > { %v460_v17 = vpop.f32.mrb[0].mxu0  ;;  %v648_v18 = vpop.f32.mrb[1].mxu1 }
 0x17a   : > { %v461_v19 = vadd.f32 %v460_v17, %v387_v16  ;;  %v659_v20 = vpop.f32.mrb[1].mxu0 }
 0x17c   : > { %v464_v21 = vmax.f32 %v461_v19, 0.0 }
 0x17e   : > { %465 = vst [vmem:[%s306_s23] sm:$0xff] %v464_v21 }
 0x17f   : > { %895 = shalt.err (!%p892_p7)
}
 0x180   : > { %s896_s10 = scalar_lea.hbm %s1257_s13, 128  ;;  %s900_s22 = scalar_lea.hbm %s1310_s4, 256 }
 0x181   : > { %p897_p13 = scmp.ne.s32.totalorder %s1257_s13, %s896_s10  ;;  %p901_p2 = scmp.lt.u32.totalorder %s1257_s13, %s1310_s4 }
 0x182   : > { %p902_p12 = scmp.lt.u32.totalorder %s900_s22, %s896_s10  ;;  %p904_p1 = scmp.lt.u32.totalorder %s896_s10, %s1257_s13 }
 0x183   : > { %p898_p8 = pnand %p897_p13, %p1334_p6 }
 0x184   : > { %p903_p0 = por %p902_p12, %p901_p2 }
 0x185   : > { %p899_p11 = pneg %p898_p8 }
 0x186   : > { %p905_p10 = por %p904_p1, %p903_p0 }
 0x188   : > { %p906_p3 = pnand %p905_p10, %p899_p11 }
 0x18a   : > { %909 = shalt.err (!%p906_p3)
}
 0x18b   : > { %685 = dma.vmem_to_hbm [thread:$0]  (%p1334_p6), %s1259_s12, 128, %s1257_s13, %s467_s11  }
 0x18c PF: > { %s493_s25 = sand.u32 1, %s956_s15   ;;  %p1335_p4 = scmp.ne.s32.totalorder %s1319_s24, 0 }
 0x18d   : > { %p1336_p9 = scmp.ge.s32.totalorder %s976_s20, 2  ;;  %s494_s27 = scalar_lea.sflag [#allocation4], %s493_s25 }
 0x18f   : > { %p702_p5 = pnand %p1336_p9, %p1335_p4 }
 0x191   : > { %951 = dma.done.wait (!%p702_p5), %s494_s27, 128  }
 0x192   : > { %953 = vsyncadd (!%p702_p5), %s494_s27, 4294967168  ;;  %s24_s20 = sadd.s32 1, %s976_s20   ;;  %s1337_s28 = sld [smem:[#allocation16_spill]] }
 0x193   : > { %p21_p7 = scmp.ge.s32.totalorder %s24_s20, 4   ;;  %s1338_s15 = smov %s960_s16 }
 0x194   : > { %s1339_s16 = smov %s964_s17  ;;  %s1340_s17 = smov %s1153_s14 }
 0x195   : > { %s1341_s18 = smov %s972_s19  ;;  %23 = sbr.rel (!%p21_p7) target bundleno = 12 (0xc), region = 104 }
 0x198   : > { %s1342_s19 = smov %s1337_s28 }
 0x19c   :  { %499 = vsyncpa [#allocation3], 1 }
 0x19d   :  { %501 = vsyncpa [#allocation3 + $0x1], 1 }
 0x19e   :  { %502 = vsyncpa [#allocation6], 1 }
 0x19f   :  { %504 = vsyncpa [#allocation6 + $0x1], 1 }
 0x1a0   :  { %505 = vsyncpa [#allocation9], 1 }
 0x1a1   :  { %506 = vsyncpa [#allocation4], 1 }
 0x1a2   :  { %508 = vsyncpa [#allocation4 + $0x1], 1 }

</bundles_post_ra>
